<compile_context>
chip_gen: v6e
topology: v6e:2x2x1
jax: 0.10.0
libtpu: 0.0.40
codegen_flags: <defaults>
</compile_context>

<pallas_src>
import functools
import numpy as np
import jax
import jax.numpy as jnp
from jax.experimental import pallas as pl
from jax.experimental.pallas import tpu as pltpu


VMEM_LIMIT = 32 * 1024 * 1024          # explicit cap; safe on v5e/v6e/v7x
ROW_BLOCK_BUDGET = 8 * 1024 * 1024     # budget for the double-buffered X row block


def round_up(x, m):
    return (x + m - 1) // m * m


def pick_row_tile(M, row_bytes):
    """Row tile: multiple of 16 (bf16 sublane packing), VMEM-budgeted cap,
    chosen to minimize ragged-edge waste (largest tile among minimal padding)."""
    cap = min(512, max(16, (ROW_BLOCK_BUDGET // (2 * max(row_bytes, 1))) // 16 * 16))
    if M < 16:
        return M                      # full-dim block (allowed by layout rules)
    best_t, best_mp = 16, None
    for t in range(cap, 15, -16):
        mp = round_up(M, t)
        if best_mp is None or mp < best_mp:
            best_t, best_mp = t, mp
    return best_t


# ----------------------------- Pallas kernels -----------------------------

def matmul_epilogue_kernel(*refs, relu, has_identity):
    """o = act(X @ W + bias [+ identity]); full-K block, f32 accumulate."""
    if has_identity:
        x_ref, w_ref, b_ref, id_ref, o_ref = refs
    else:
        x_ref, w_ref, b_ref, o_ref = refs
    acc = jnp.dot(x_ref[...], w_ref[...], preferred_element_type=jnp.float32)
    y = acc + b_ref[...]
    if has_identity:
        y = y + id_ref[...].astype(jnp.float32)
    if relu:
        y = jnp.maximum(y, 0.0)
    o_ref[...] = y.astype(o_ref.dtype)


def max_tree_kernel(*refs):
    """o = elementwise max over the (kh*kw) shifted-view inputs."""
    o_ref = refs[-1]
    m = refs[0][...]
    for r in refs[1:-1]:
        m = jnp.maximum(m, r[...])
    o_ref[...] = m


def avgpool_fc_kernel(x_ref, w_ref, b_ref, o_ref, *, inv_count):
    """o = mean_HW(x) @ W_fc + b_fc  (f32 reduce/accumulate, bf16 MXU)."""
    feat = jnp.sum(x_ref[...].astype(jnp.float32), axis=1) * inv_count
    acc = jnp.dot(feat.astype(jnp.bfloat16), w_ref[...],
                  preferred_element_type=jnp.float32)
    o_ref[...] = acc + b_ref[...]


# ----------------------------- Pallas wrappers -----------------------------

def matmul_bias_act(x, w, b, *, relu, identity=None, out_dtype=jnp.bfloat16):
    """x:(M,K) bf16 @ w:(K,N) bf16 -> (M,N), fused bias (+identity) (+relu).

    Full K reduction per block; full N (weight resident across all row tiles)
    whenever the weight fits the VMEM budget (always true for this network).
    Ragged M edge blocks rely on Pallas OOB masking - no padding copies.
    """
    M, K = x.shape
    K2, N = w.shape
    assert K == K2 and b.shape == (1, N)

    # N tile: keep the whole weight resident when it fits the budget.
    if K * N * 2 * 2 <= 12 * 1024 * 1024:
        tn = N
    elif N % 256 == 0:
        tn = 256
    elif N % 128 == 0:
        tn = 128
    else:
        tn = N

    # bytes per X row (+ output/identity rows) -> VMEM-budgeted row tile.
    tm = pick_row_tile(M, (K + 2 * tn) * 2)
    grid = (pl.cdiv(M, tm), N // tn)

    args = [x, w, b]
    in_specs = [
        pl.BlockSpec((tm, K), lambda i, j: (i, 0)),   # X row tile (K resident)
        pl.BlockSpec((K, tn), lambda i, j: (0, j)),   # weight (resident if tn==N)
        pl.BlockSpec((1, tn), lambda i, j: (0, j)),   # bias
    ]
    has_identity = identity is not None
    if has_identity:
        args.append(identity)
        in_specs.append(pl.BlockSpec((tm, tn), lambda i, j: (i, j)))

    return pl.pallas_call(
        functools.partial(matmul_epilogue_kernel, relu=relu,
                          has_identity=has_identity),
        out_shape=jax.ShapeDtypeStruct((M, N), out_dtype),
        grid=grid,
        in_specs=in_specs,
        out_specs=pl.BlockSpec((tm, tn), lambda i, j: (i, j)),
        compiler_params=pltpu.CompilerParams(
            dimension_semantics=("parallel", "parallel"),
            vmem_limit_bytes=VMEM_LIMIT),
    )(*args)


def maxpool2d(x, k=3, s=2, p=1):
    """PyTorch MaxPool2d(kernel=k, stride=s, padding=p), NHWC bf16."""
    N, H, W, C = x.shape
    OH = (H + 2 * p - k) // s + 1
    OW = (W + 2 * p - k) // s + 1
    xp = jnp.pad(x, ((0, 0), (p, p), (p, p), (0, 0)),
                 constant_values=-jnp.inf)
    views = [xp[:, ki:ki + s * OH:s, kj:kj + s * OW:s, :].reshape(N * OH * OW, C)
             for ki in range(k) for kj in range(k)]

    M = N * OH * OW
    tm = pick_row_tile(M, (len(views) + 1) * C * 2)

    out = pl.pallas_call(
        max_tree_kernel,
        out_shape=jax.ShapeDtypeStruct((M, C), x.dtype),
        grid=(pl.cdiv(M, tm),),
        in_specs=[pl.BlockSpec((tm, C), lambda i: (i, 0))] * len(views),
        out_specs=pl.BlockSpec((tm, C), lambda i: (i, 0)),
        compiler_params=pltpu.CompilerParams(
            dimension_semantics=("parallel",),
            vmem_limit_bytes=VMEM_LIMIT),
    )(*views)
    return out.reshape(N, OH, OW, C)


def avgpool_fc(x, fc_w, fc_b):
    """AdaptiveAvgPool2d(1) + flatten + Linear, fused. NHWC bf16 -> (N, n_pad) f32."""
    N, H, W, C = x.shape
    HW = H * W
    x2 = x.reshape(N, HW, C)
    n_pad = fc_w.shape[1]
    if N <= 8:
        tb, Nb = N, N
    else:
        tb = 8
        Nb = round_up(N, tb)
        if Nb != N:
            x2 = jnp.pad(x2, ((0, Nb - N), (0, 0), (0, 0)))
    out = pl.pallas_call(
        functools.partial(avgpool_fc_kernel, inv_count=1.0 / HW),
        out_shape=jax.ShapeDtypeStruct((Nb, n_pad), jnp.float32),
        grid=(Nb // tb,),
        in_specs=[pl.BlockSpec((tb, HW, C), lambda i: (i, 0, 0)),
                  pl.BlockSpec((C, n_pad), lambda i: (0, 0)),
                  pl.BlockSpec((1, n_pad), lambda i: (0, 0))],
        out_specs=pl.BlockSpec((tb, n_pad), lambda i: (i, 0)),
        compiler_params=pltpu.CompilerParams(
            dimension_semantics=("parallel",),
            vmem_limit_bytes=VMEM_LIMIT),
    )(x2, fc_w, fc_b)
    return out[:N]


# ----------------------------- conv via im2col -----------------------------

def im2col(x, kh, kw, stride, pad):
    # TODO(synk): patches are kh*kw x the activation size in HBM; replace with
    # a halo-DMA tap-accumulating conv kernel to remove this traffic.
    N, H, W, C = x.shape
    OH = (H + 2 * pad - kh) // stride + 1
    OW = (W + 2 * pad - kw) // stride + 1
    xp = jnp.pad(x, ((0, 0), (pad, pad), (pad, pad), (0, 0)))
    cols = [xp[:, ki:ki + stride * OH:stride, kj:kj + stride * OW:stride, :]
            for ki in range(kh) for kj in range(kw)]
    patches = jnp.stack(cols, axis=3)          # (N, OH, OW, kh*kw, C)
    return patches.reshape(N * OH * OW, kh * kw * C), OH, OW


def conv_bn_act(x, conv, stride, pad, relu, identity=None,
                out_dtype=jnp.bfloat16):
    """Conv2d(bias=False) + BN(eval, folded into weights) [+ residual] [+ ReLU]."""
    kh, kw = conv["ksize"]
    cout = conv["cout"]
    N = x.shape[0]
    if kh == 1 and kw == 1:
        xs = x if stride == 1 else x[:, ::stride, ::stride, :]
        _, OH, OW, C = xs.shape
        patches = xs.reshape(N * OH * OW, C)
    else:
        patches, OH, OW = im2col(x, kh, kw, stride, pad)
    id2 = None if identity is None else identity.reshape(N * OH * OW, cout)
    y = matmul_bias_act(patches, conv["w"], conv["b"], relu=relu,
                        identity=id2, out_dtype=out_dtype)
    return y.reshape(N, OH, OW, cout)


def basic_block(x, blk):
    s = blk["stride"]
    out = conv_bn_act(x, blk["conv1"], s, 1, relu=True)
    if "down" in blk:
        identity = conv_bn_act(x, blk["down"], s, 0, relu=False)
    else:
        identity = x
    # residual add + ReLU fused into conv2's matmul epilogue
    return conv_bn_act(out, blk["conv2"], 1, 1, relu=True, identity=identity)


# ----------------------------- parameters ----------------------------------

def make_conv_bn(key, kh, kw, cin, cout):
    k1, k2, k3 = jax.random.split(key, 3)
    fan_in = kh * kw * cin
    w = jax.random.normal(k1, (kh, kw, cin, cout), jnp.float32) * np.sqrt(2.0 / fan_in)
    gamma = 1.0 + 0.1 * jax.random.normal(k2, (cout,), jnp.float32)
    beta = 0.1 * jax.random.normal(k3, (cout,), jnp.float32)
    eps = 1e-5
    # eval-mode BN with running_mean=0, running_var=1: scale folded into W cols.
    scale = gamma / np.float32(np.sqrt(1.0 + eps))
    w_folded = (w * scale[None, None, None, :]).reshape(kh * kw * cin, cout)
    return {"w": w_folded.astype(jnp.bfloat16),
            "b": beta.reshape(1, cout).astype(jnp.float32),
            "ksize": (kh, kw), "cin": cin, "cout": cout}


def make_params(key, num_channels, num_classes=1000):
    keys = jax.random.split(key, 64)
    ki = iter(keys)
    params = {"stem": make_conv_bn(next(ki), 7, 7, num_channels, 64)}
    widths = [64, 128, 256, 512]
    in_c = 64
    layers = []
    for li, c in enumerate(widths):
        blocks = []
        for bi in range(2):
            stride = 2 if (li > 0 and bi == 0) else 1
            blk = {
                "conv1": make_conv_bn(next(ki), 3, 3, in_c, c),
                "conv2": make_conv_bn(next(ki), 3, 3, c, c),
                "stride": stride,
            }
            if stride != 1 or in_c != c:
                blk["down"] = make_conv_bn(next(ki), 1, 1, in_c, c)
            blocks.append(blk)
            in_c = c
        layers.append(blocks)
    params["layers"] = layers

    kfc1, kfc2 = jax.random.split(next(ki))
    bound = 1.0 / np.sqrt(512.0)
    fc_w = jax.random.uniform(kfc1, (512, num_classes), jnp.float32, -bound, bound)
    fc_b = jax.random.uniform(kfc2, (num_classes,), jnp.float32, -bound, bound)
    n_pad = round_up(num_classes, 128)
    # pre-pad / pre-cast FC weights once at build time (weights are constants)
    params["fc_w"] = jnp.zeros((512, n_pad), jnp.bfloat16).at[:, :num_classes].set(
        fc_w.astype(jnp.bfloat16))
    params["fc_b"] = jnp.zeros((1, n_pad), jnp.float32).at[0, :num_classes].set(fc_b)
    params["num_classes"] = num_classes
    return params


# ----------------------------- forward --------------------------------------

def custom_resnet_forward(x_nchw, params):
    # NCHW -> NHWC, bf16 activations for the MXU
    x = jnp.transpose(x_nchw, (0, 2, 3, 1)).astype(jnp.bfloat16)
    x = conv_bn_act(x, params["stem"], stride=2, pad=3, relu=True)
    x = maxpool2d(x, k=3, s=2, p=1)
    for layer in params["layers"]:
        for blk in layer:
            x = basic_block(x, blk)
    logits = avgpool_fc(x, params["fc_w"], params["fc_b"])   # fused pool + FC
    return logits[:, :params["num_classes"]]                 # (N, 1000) f32


if __name__ == "__main__":
    num_channels = 4
    key = jax.random.PRNGKey(0)
    kx, kp = jax.random.split(key)
    # small input consistent with the module's (B, num_channels, H, W) contract
    x = jax.random.normal(kx, (2, num_channels, 16, 16), jnp.float32)
    params = make_params(kp, num_channels)
    logits = custom_resnet_forward(x, params)
    jax.block_until_ready(logits)
    assert logits.shape == (2, 1000) and logits.dtype == jnp.float32
    print("KERNEL_OK")
</pallas_src>

<mosaic_0001>
module attributes {stable_mosaic.version = 11 : i64} {
  func.func @matmul_epilogue_kernel(%arg0: i32, %arg1: i32, %arg2: memref<128x196xbf16, #tpu.memory_space<vmem>>, %arg3: memref<196x64xbf16, #tpu.memory_space<vmem>>, %arg4: memref<1x64xf32, #tpu.memory_space<vmem>>, %arg5: memref<128x64xbf16, #tpu.memory_space<vmem>>) attributes {dimension_semantics = [#tpu.dimension_semantics<parallel>, #tpu.dimension_semantics<parallel>], iteration_bounds = array<i64: 1, 1>, scalar_prefetch = 0 : i64, scratch_operands = 0 : i64, tpu.core_type = #tpu.core_type<tc>, window_params = [{transform_indices = @transform_0, window_bounds = array<i64: 128, 196>}, {transform_indices = @transform_1, window_bounds = array<i64: 196, 64>}, {transform_indices = @transform_2, window_bounds = array<i64: 1, 64>}, {transform_indices = @transform_3, window_bounds = array<i64: 128, 64>}]} {
    %c0 = arith.constant 0 : index
    %c0_0 = arith.constant 0 : index
    %0 = vector.load %arg2[%c0, %c0_0] : memref<128x196xbf16, #tpu.memory_space<vmem>>, vector<128x196xbf16>
    %c0_1 = arith.constant 0 : index
    %c0_2 = arith.constant 0 : index
    %1 = vector.load %arg3[%c0_1, %c0_2] : memref<196x64xbf16, #tpu.memory_space<vmem>>, vector<196x64xbf16>
    %cst = arith.constant dense<0.000000e+00> : vector<128x64xf32>
    %2 = tpu.matmul %0, %1, %cst {dimension_numbers = #tpu.dot_dimension_numbers<[1], [0], [0], [1], [0, 0, 1, 1], [], []>} : vector<128x196xbf16>, vector<196x64xbf16>, vector<128x64xf32> -> vector<128x64xf32>
    %c0_3 = arith.constant 0 : index
    %c0_4 = arith.constant 0 : index
    %3 = vector.load %arg4[%c0_3, %c0_4] : memref<1x64xf32, #tpu.memory_space<vmem>>, vector<1x64xf32>
    %4 = vector.broadcast %3 : vector<1x64xf32> to vector<128x64xf32>
    %5 = arith.addf %2, %4 : vector<128x64xf32>
    %cst_5 = arith.constant 0.000000e+00 : f32
    %6 = vector.broadcast %cst_5 : f32 to vector<128x64xf32>
    %7 = arith.maximumf %5, %6 : vector<128x64xf32>
    %8 = arith.truncf %7 : vector<128x64xf32> to vector<128x64xbf16>
    %c0_6 = arith.constant 0 : index
    %c0_7 = arith.constant 0 : index
    %9 = vector.load %arg5[%c0_6, %c0_7] : memref<128x64xbf16, #tpu.memory_space<vmem>>, vector<128x64xbf16>
    tpu.vector_store %arg5[%c0_6, %c0_7], %8 {strides = array<i32>} : memref<128x64xbf16, #tpu.memory_space<vmem>>, vector<128x64xbf16>,
    return
  }
  func.func @transform_0(%arg0: i32, %arg1: i32) -> (i32, i32) {
    %c0_i32 = arith.constant 0 : i32
    %c0_i32_0 = arith.constant 0 : i32
    return %arg0, %c0_i32 : i32, i32
  }
  func.func @transform_1(%arg0: i32, %arg1: i32) -> (i32, i32) {
    %c0_i32 = arith.constant 0 : i32
    %c0_i32_0 = arith.constant 0 : i32
    return %c0_i32, %arg1 : i32, i32
  }
  func.func @transform_2(%arg0: i32, %arg1: i32) -> (i32, i32) {
    %c0_i32 = arith.constant 0 : i32
    %c0_i32_0 = arith.constant 0 : i32
    return %c0_i32, %arg1 : i32, i32
  }
  func.func @transform_3(%arg0: i32, %arg1: i32) -> (i32, i32) {
    %c0_i32 = arith.constant 0 : i32
    return %arg0, %arg1 : i32, i32
  }
}

</mosaic_0001>

<bundles_post_ra>
// kernel: tpu_custom_call.1
= control target key start
LH: loop header
LB: loop body
LE: loop exit
PB: predicated region body
PF: predicated region fallthrough
CT: control target
= control target key end

     0   :  { %v571_v0 = vmov 0   ;;  %vm210_vm0 = vcmask 556032   ;;  %vm235_vm1 = vcmask 1041408   ;;  %vm416_vm2 = vcmask 519168   ;;  %s798_s1 = inlined_call_operand.vmem [shape: bf16[196,64], index: 1, kind: input, shape index: {}]   ;;  %s799_s0 = inlined_call_operand.vmem [shape: bf16[128,196], index: 0, kind: input, shape index: {}]   ;;  %s800_s2 = inlined_call_operand.vmem [shape: f32[1,64], index: 2, kind: input, shape index: {}]   ;;  %s801_s3 = inlined_call_operand.vmem [shape: bf16[128,64], index: 3, kind: output, shape index: {}]  }
   0x1   :  { %239 = vmatprep.subr.bf16.mxu0 %v571_v0  ;;  %507 = vmatprep.subr.bf16.mxu1 %v571_v0  ;;  %v534_v1 = vld [vmem:[%s798_s1 + $0x38] sm:$0xff]   ;;  %v535_v2 = vld [vmem:[%s798_s1 + $0x30] sm:$0xff]   ;;  %v536_v3 = vld [vmem:[%s798_s1 + $0x28] sm:$0xff]  }
   0x2   :  { %240 = vmatpush1.bf16.msra.mxu0 %v534_v1  ;;  %520 = vmatpush1.bf16.msra.mxu1 %v534_v1  ;;  %v537_v4 = vld [vmem:[%s798_s1 + $0x20] sm:$0xff]   ;;  %v538_v6 = vld [vmem:[%s798_s1 + $0x18] sm:$0xff]   ;;  %v539_v8 = vld [vmem:[%s798_s1 + $0x10] sm:$0xff]  }
   0x3   :  { %241 = vmatprep.subr.bf16.mxu0 %v571_v0  ;;  %508 = vmatprep.subr.bf16.mxu1 %v571_v0  ;;  %v549_v5 = vld [vmem:[%s799_s0 + $0x4] ss:$8 sps:$4 sm:$0xff]   ;;  %v542_v11 = vld [vmem:[%s798_s1 + $0x60] ss:$0 sps:$4 sm:$0x33]   ;;  %v543_v13 = vld [vmem:[%s798_s1 + $0x58] sm:$0xff]  }
   0x4   :  { %v552_v7 = vld [vmem:[%s799_s0 + $0x44] ss:$8 sps:$4 sm:$0xff]   ;;  %467 = vmatprep.mubr.msk.bf16.mxu0 %vm210_vm0, %v549_v5  ;;  %v237_v12 = vsel %vm235_vm1, %v542_v11, 0  ;;  %v544_v14 = vld [vmem:[%s798_s1 + $0x50] sm:$0xff]   ;;  %v547_v17 = vld [vmem:[%s799_s0] ss:$8 sps:$4 sm:$0xff]  }
   0x5   :  { %471 = vmatprep.mubr.msk.bf16.mxu1 %vm210_vm0, %v552_v7  ;;  %v540_v9 = vld [vmem:[%s798_s1 + $0x8] sm:$0xff]   ;;  %v541_v10 = vld [vmem:[%s798_s1] sm:$0xff]   ;;  %v553_v19 = vld [vmem:[%s799_s0 + $0x14] ss:$8 sps:$4 sm:$0xff]  }
   0x6   :  { %242 = vmatpush1.bf16.msra.mxu0 %v535_v2  ;;  %521 = vmatpush1.bf16.msra.mxu1 %v535_v2  ;;  %v545_v15 = vld [vmem:[%s798_s1 + $0x48] sm:$0xff]   ;;  %v546_v16 = vld [vmem:[%s798_s1 + $0x40] sm:$0xff]   ;;  %v555_v20 = vld [vmem:[%s799_s0 + $0x54] ss:$8 sps:$4 sm:$0xff]  }
   0x7   :  { %243 = vmatprep.subr.bf16.mxu0 %v571_v0  ;;  %509 = vmatprep.subr.bf16.mxu1 %v571_v0  ;;  %v550_v18 = vld [vmem:[%s799_s0 + $0x40] ss:$8 sps:$4 sm:$0xff]   ;;  %v557_v21 = vld [vmem:[%s799_s0 + $0x10] ss:$8 sps:$4 sm:$0xff]   ;;  %v559_v23 = vld [vmem:[%s799_s0 + $0x24] ss:$8 sps:$4 sm:$0xff]  }
   0x8   :  { %v558_v22 = vld [vmem:[%s799_s0 + $0x50] ss:$8 sps:$4 sm:$0xff]   ;;  %v561_v24 = vld [vmem:[%s799_s0 + $0x64] ss:$8 sps:$4 sm:$0xff]   ;;  %v563_v25 = vld [vmem:[%s799_s0 + $0x20] ss:$8 sps:$4 sm:$0xff]  }
   0x9   :  { %v564_v26 = vld [vmem:[%s799_s0 + $0x60] ss:$8 sps:$4 sm:$0xff]   ;;  %v565_v27 = vld [vmem:[%s799_s0 + $0x34] ss:$8 sps:$4 sm:$0xff]   ;;  %v569_v29 = vld [vmem:[%s799_s0 + $0x30] ss:$8 sps:$4 sm:$0xff]  }
   0xa   :  { %244 = vmatpush1.bf16.msra.mxu0 %v536_v3  ;;  %522 = vmatpush1.bf16.msra.mxu1 %v536_v3  ;;  %v567_v28 = vld [vmem:[%s799_s0 + $0x74] ss:$8 sps:$4 sm:$0xff]   ;;  %v570_v30 = vld [vmem:[%s799_s0 + $0x70] ss:$8 sps:$4 sm:$0xff]   ;;  %v716_v31 = vld [vmem:[%s800_s2] ss:$0 sm:$0xff] }
   0xb   :  { %245 = vmatprep.subr.bf16.mxu0 %v571_v0  ;;  %510 = vmatprep.subr.bf16.mxu1 %v571_v0 }
   0xe   :  { %246 = vmatpush1.bf16.msra.mxu0 %v537_v4  ;;  %523 = vmatpush1.bf16.msra.mxu1 %v537_v4 }
   0xf   :  { %247 = vmatprep.subr.bf16.mxu0 %v571_v0  ;;  %511 = vmatprep.subr.bf16.mxu1 %v571_v0 }
  0x12   :  { %248 = vmatpush1.bf16.msra.mxu0 %v538_v6  ;;  %524 = vmatpush1.bf16.msra.mxu1 %v538_v6 }
  0x13   :  { %249 = vmatprep.subr.bf16.mxu0 %v571_v0  ;;  %512 = vmatprep.subr.bf16.mxu1 %v571_v0 }
  0x16   :  { %250 = vmatpush1.bf16.msra.mxu0 %v539_v8  ;;  %525 = vmatpush1.bf16.msra.mxu1 %v539_v8 }
  0x17   :  { %251 = vmatprep.subr.bf16.mxu0 %v571_v0  ;;  %513 = vmatprep.subr.bf16.mxu1 %v571_v0 }
  0x1a   :  { %252 = vmatpush1.bf16.msra.mxu0 %v540_v9  ;;  %526 = vmatpush1.bf16.msra.mxu1 %v540_v9 }
  0x1b   :  { %253 = vmatprep.subr.bf16.mxu0 %v571_v0  ;;  %514 = vmatprep.subr.bf16.mxu1 %v571_v0 }
  0x1e   :  { %254 = vmatpush1.bf16.msra.mxu0 %v541_v10  ;;  %527 = vmatpush1.bf16.msra.mxu1 %v541_v10 }
  0x1f   :  { %261 = vmatprep.subr.bf16.mxu0 %v571_v0  ;;  %515 = vmatprep.subr.bf16.mxu1 %v571_v0 }
  0x22   :  { %262 = vmatpush2.bf16.msra.mxu0 %v237_v12  ;;  %528 = vmatpush2.bf16.msra.mxu1 %v237_v12 }
  0x23   :  { %263 = vmatprep.subr.bf16.mxu0 %v571_v0  ;;  %516 = vmatprep.subr.bf16.mxu1 %v571_v0 }
  0x26   :  { %264 = vmatpush2.bf16.msra.mxu0 %v543_v13  ;;  %529 = vmatpush2.bf16.msra.mxu1 %v543_v13 }
  0x27   :  { %265 = vmatprep.subr.bf16.mxu0 %v571_v0  ;;  %517 = vmatprep.subr.bf16.mxu1 %v571_v0 }
  0x2a   :  { %266 = vmatpush2.bf16.msra.mxu0 %v544_v14  ;;  %530 = vmatpush2.bf16.msra.mxu1 %v544_v14 }
  0x2b   :  { %267 = vmatprep.subr.bf16.mxu0 %v571_v0  ;;  %518 = vmatprep.subr.bf16.mxu1 %v571_v0 }
  0x2e   :  { %268 = vmatpush2.bf16.msra.mxu0 %v545_v15  ;;  %531 = vmatpush2.bf16.msra.mxu1 %v545_v15 }
  0x2f   :  { %269 = vmatprep.subr.bf16.mxu0 %v571_v0  ;;  %519 = vmatprep.subr.bf16.mxu1 %v571_v0 }
  0x32   :  { %270 = vmatpush2.bf16.msra.mxu0 %v546_v16  ;;  %532 = vmatpush2.bf16.msra.mxu1 %v546_v16 }
  0x35   :  { %272 = vmatmul.mubr.bf16.vlgmr.msra.gmra.mxu0 %v547_v17  ;;  %304 = vmatmul.mubr.bf16.vlgmr.msra.gmra.mxu1 %v550_v18 }
  0x36   :  { %468 = vmatprep.mubr.msk.bf16.mxu0 %vm210_vm0, %v553_v19  ;;  %472 = vmatprep.mubr.msk.bf16.mxu1 %vm210_vm0, %v555_v20 }
  0x3d   :  { %280 = vmatmul.mubr.bf16.gmra.mxu0 %v557_v21  ;;  %312 = vmatmul.mubr.bf16.gmra.mxu1 %v558_v22 }
  0x3e   :  { %469 = vmatprep.mubr.msk.bf16.mxu0 %vm210_vm0, %v559_v23  ;;  %473 = vmatprep.mubr.msk.bf16.mxu1 %vm210_vm0, %v561_v24 }
  0x45   :  { %288 = vmatmul.mubr.bf16.gmra.mxu0 %v563_v25  ;;  %320 = vmatmul.mubr.bf16.gmra.mxu1 %v564_v26 }
  0x46   :  { %470 = vmatprep.mubr.msk.bf16.mxu0 %vm210_vm0, %v565_v27  ;;  %474 = vmatprep.mubr.msk.bf16.mxu1 %vm210_vm0, %v567_v28 }
  0x4d   :  { %296 = vmatmul.mubr.bf16.gmra.mxu0 %v569_v29  ;;  %328 = vmatmul.mubr.bf16.gmra.mxu1 %v570_v30 }
  0xf5   :  { %v273_v32 = vpop.f32.mrf.mxu0  ;;  %v305_v33 = vpop.f32.mrf.mxu1 }
  0xf6   :  { %v274_v34 = vadd.f32 %v716_v31, %v273_v32  ;;  %v306_v35 = vadd.f32 %v716_v31, %v305_v33 }
  0xf7   :  { %v275_v36 = vpop.f32.mrf.mxu0  ;;  %v307_v37 = vpop.f32.mrf.mxu1 }
  0xf8   :  { %v336_v38 = vmax.f32 %v274_v34, 0.0  ;;  %v344_v39 = vmax.f32 %v306_v35, 0.0 }
  0xf9   :  { %v276_v40 = vpop.f32.mrf.mxu0  ;;  %v308_v41 = vpop.f32.mrf.mxu1 }
  0xfa   :  { %v491_v42 = vpack.c.bf16 %v336_v38, %v336_v38  ;;  %v499_v43 = vpack.c.bf16 %v344_v39, %v344_v39  ;;  %v277_v44 = vadd.f32 %v716_v31, %v276_v40  ;;  %v309_v45 = vadd.f32 %v716_v31, %v308_v41 }
  0xfb   :  { %v278_v46 = vpop.f32.mrf.mxu0  ;;  %v310_v47 = vpop.f32.mrf.mxu1 }
  0xfc   :  { %417 = vst.msk [vmem:[%s801_s3] sm:$0xf] %vm416_vm2, %v491_v42  ;;  %425 = vst.msk [vmem:[%s801_s3 + $0x20] sm:$0xf] %vm416_vm2, %v499_v43  ;;  %v337_v48 = vmax.f32 %v277_v44, 0.0  ;;  %v345_v49 = vmax.f32 %v309_v45, 0.0 }
  0xfd   :  { %v281_v50 = vpop.f32.mrf.mxu0  ;;  %v313_v51 = vpop.f32.mrf.mxu1 }
  0xfe   :  { %v492_v52 = vpack.c.bf16 %v337_v48, %v337_v48  ;;  %v500_v53 = vpack.c.bf16 %v345_v49, %v345_v49  ;;  %v282_v54 = vadd.f32 %v716_v31, %v281_v50  ;;  %v314_v55 = vadd.f32 %v716_v31, %v313_v51 }
  0xff   :  { %v283_v56 = vpop.f32.mrf.mxu0  ;;  %v315_v57 = vpop.f32.mrf.mxu1 }
 0x100   :  { %418 = vst.msk [vmem:[%s801_s3 + $0x4] sm:$0xf] %vm416_vm2, %v492_v52  ;;  %426 = vst.msk [vmem:[%s801_s3 + $0x24] sm:$0xf] %vm416_vm2, %v500_v53  ;;  %v338_v58 = vmax.f32 %v282_v54, 0.0  ;;  %v346_v59 = vmax.f32 %v314_v55, 0.0 }
 0x101   :  { %v284_v60 = vpop.f32.mrf.mxu0  ;;  %v316_v61 = vpop.f32.mrf.mxu1 }
 0x102   :  { %v493_v62 = vpack.c.bf16 %v338_v58, %v338_v58  ;;  %v501_v63 = vpack.c.bf16 %v346_v59, %v346_v59  ;;  %v285_v0 = vadd.f32 %v716_v31, %v284_v60  ;;  %v317_v1 = vadd.f32 %v716_v31, %v316_v61 }
 0x103   :  { %v286_v2 = vpop.f32.mrf.mxu0  ;;  %v318_v3 = vpop.f32.mrf.mxu1 }
 0x104   :  { %419 = vst.msk [vmem:[%s801_s3 + $0x8] sm:$0xf] %vm416_vm2, %v493_v62  ;;  %427 = vst.msk [vmem:[%s801_s3 + $0x28] sm:$0xf] %vm416_vm2, %v501_v63  ;;  %v339_v4 = vmax.f32 %v285_v0, 0.0  ;;  %v347_v5 = vmax.f32 %v317_v1, 0.0 }
 0x105   :  { %v289_v6 = vpop.f32.mrf.mxu0  ;;  %v321_v7 = vpop.f32.mrf.mxu1 }
 0x106   :  { %v494_v8 = vpack.c.bf16 %v339_v4, %v339_v4  ;;  %v502_v9 = vpack.c.bf16 %v347_v5, %v347_v5  ;;  %v290_v10 = vadd.f32 %v716_v31, %v289_v6  ;;  %v322_v11 = vadd.f32 %v716_v31, %v321_v7 }
 0x107   :  { %v291_v12 = vpop.f32.mrf.mxu0  ;;  %v323_v13 = vpop.f32.mrf.mxu1 }
 0x108   :  { %420 = vst.msk [vmem:[%s801_s3 + $0xc] sm:$0xf] %vm416_vm2, %v494_v8  ;;  %428 = vst.msk [vmem:[%s801_s3 + $0x2c] sm:$0xf] %vm416_vm2, %v502_v9  ;;  %v340_v14 = vmax.f32 %v290_v10, 0.0  ;;  %v348_v15 = vmax.f32 %v322_v11, 0.0 }
 0x109   :  { %v292_v16 = vpop.f32.mrf.mxu0  ;;  %v324_v17 = vpop.f32.mrf.mxu1 }
 0x10a   :  { %v495_v18 = vpack.c.bf16 %v340_v14, %v340_v14  ;;  %v503_v19 = vpack.c.bf16 %v348_v15, %v348_v15  ;;  %v293_v20 = vadd.f32 %v716_v31, %v292_v16  ;;  %v325_v21 = vadd.f32 %v716_v31, %v324_v17 }
 0x10b   :  { %v294_v22 = vpop.f32.mrf.mxu0  ;;  %v326_v23 = vpop.f32.mrf.mxu1 }
 0x10c   :  { %421 = vst.msk [vmem:[%s801_s3 + $0x10] sm:$0xf] %vm416_vm2, %v495_v18  ;;  %429 = vst.msk [vmem:[%s801_s3 + $0x30] sm:$0xf] %vm416_vm2, %v503_v19  ;;  %v341_v24 = vmax.f32 %v293_v20, 0.0  ;;  %v349_v25 = vmax.f32 %v325_v21, 0.0 }
 0x10d   :  { %v297_v26 = vpop.f32.mrf.mxu0  ;;  %v329_v27 = vpop.f32.mrf.mxu1 }
 0x10e   :  { %v496_v28 = vpack.c.bf16 %v341_v24, %v341_v24  ;;  %v504_v29 = vpack.c.bf16 %v349_v25, %v349_v25  ;;  %v298_v30 = vadd.f32 %v716_v31, %v297_v26  ;;  %v330_v32 = vadd.f32 %v716_v31, %v329_v27 }
 0x10f   :  { %v299_v33 = vpop.f32.mrf.mxu0  ;;  %v331_v34 = vpop.f32.mrf.mxu1 }
 0x110   :  { %422 = vst.msk [vmem:[%s801_s3 + $0x14] sm:$0xf] %vm416_vm2, %v496_v28  ;;  %430 = vst.msk [vmem:[%s801_s3 + $0x34] sm:$0xf] %vm416_vm2, %v504_v29  ;;  %v342_v35 = vmax.f32 %v298_v30, 0.0  ;;  %v350_v36 = vmax.f32 %v330_v32, 0.0 }
 0x111   :  { %v300_v37 = vpop.f32.mrf.mxu0  ;;  %v332_v38 = vpop.f32.mrf.mxu1 }
 0x112   :  { %v497_v39 = vpack.c.bf16 %v342_v35, %v342_v35  ;;  %v505_v40 = vpack.c.bf16 %v350_v36, %v350_v36  ;;  %v301_v41 = vadd.f32 %v716_v31, %v300_v37  ;;  %v333_v42 = vadd.f32 %v716_v31, %v332_v38 }
 0x113   :  { %v302_v43 = vpop.f32.mrf.mxu0  ;;  %v334_v44 = vpop.f32.mrf.mxu1 }
 0x114   :  { %423 = vst.msk [vmem:[%s801_s3 + $0x18] sm:$0xf] %vm416_vm2, %v497_v39  ;;  %431 = vst.msk [vmem:[%s801_s3 + $0x38] sm:$0xf] %vm416_vm2, %v505_v40  ;;  %v343_v45 = vmax.f32 %v301_v41, 0.0  ;;  %v351_v46 = vmax.f32 %v333_v42, 0.0 }
 0x116   :  { %v498_v47 = vpack.c.bf16 %v343_v45, %v343_v45  ;;  %v506_v48 = vpack.c.bf16 %v351_v46, %v351_v46 }
 0x118   :  { %424 = vst.msk [vmem:[%s801_s3 + $0x1c] sm:$0xf] %vm416_vm2, %v498_v47  ;;  %432 = vst.msk [vmem:[%s801_s3 + $0x3c] sm:$0xf] %vm416_vm2, %v506_v48 }

</bundles_post_ra>
